<compile_context>
chip_gen: v5e
topology: v5e:2x2
jax: 0.10.0
libtpu: 0.0.40
codegen_flags: <defaults>
</compile_context>

<pallas_src>
import functools

import jax
import jax.numpy as jnp
from jax.experimental import pallas as pl
from jax.experimental.pallas import tpu as pltpu


def _psi_fused_kernel(x_ref, *rest, n_layers: int):
    """Fused MLP forward: chained (matmul + bias [+ tanh]) entirely on-chip.

    rest = (w0, b0, w1, b1, ..., w_{n-1}, b_{n-1}, o_ref)
    w_i: [in_i, out_i] (lane-dense output features), b_i: [1, out_i].
    """
    o_ref = rest[-1]
    p = rest[:-1]
    h = x_ref[...]
    for i in range(n_layers):
        w = p[2 * i][...]
        b = p[2 * i + 1][...]
        h = jnp.dot(h, w, preferred_element_type=jnp.float32) + b
        if i != n_layers - 1:
            h = jnp.tanh(h)  # activation after every layer except the last
    o_ref[...] = h.astype(o_ref.dtype)


def init_psi_params(key, hidden_channels):
    """Deterministic init matching nn.Linear shapes (W: [out, in], b: [out])."""
    params = []
    for k in range(1, len(hidden_channels)):
        fan_in = hidden_channels[k - 1]
        fan_out = hidden_channels[k]
        key, kw, kb = jax.random.split(key, 3)
        bound = 1.0 / jnp.sqrt(fan_in)
        w = jax.random.uniform(kw, (fan_out, fan_in), jnp.float32, -bound, bound)
        b = jax.random.uniform(kb, (fan_out,), jnp.float32, -bound, bound)
        params.append((w, b))
    return params


def prep_psi_params(params):
    """One-time layout prep outside the hot path: W -> [in, out], b -> [1, out]."""
    return [(jnp.asarray(w).T, jnp.asarray(b).reshape(1, -1)) for w, b in params]


def psi_forward(x, prepped_params, *, batch_tile=512):
    """Psi.forward(x) as a single fused Pallas kernel.

    x: [B, hidden_channels[0]] float32.
    prepped_params: list of (w_t [in, out], b [1, out]) from prep_psi_params.
    """
    n_layers = len(prepped_params)
    B, IN = x.shape
    OUT = prepped_params[-1][0].shape[1]
    kernel = functools.partial(_psi_fused_kernel, n_layers=n_layers)

    flat_params = []
    for w_t, b2 in prepped_params:
        flat_params.extend((w_t, b2))

    if B <= batch_tile:
        # Everything (x, all weights, out) fits one VMEM residency: grid-less
        # single-block call, no pipeline machinery at all.
        return pl.pallas_call(
            kernel,
            out_shape=jax.ShapeDtypeStruct((B, OUT), jnp.float32),
        )(x, *flat_params)

    # Large batch: tile the batch axis ("parallel" -> megacore shardable),
    # keep every weight/bias full-block so it stays VMEM-resident across tiles.
    TB = batch_tile
    n_tiles = pl.cdiv(B, TB)
    B_pad = n_tiles * TB
    if B_pad != B:
        x = jnp.pad(x, ((0, B_pad - B), (0, 0)))

    in_specs = [pl.BlockSpec((TB, IN), lambda i: (i, 0))]
    for w_t, b2 in prepped_params:
        in_specs.append(pl.BlockSpec(w_t.shape, lambda i: (0, 0)))
        in_specs.append(pl.BlockSpec(b2.shape, lambda i: (0, 0)))

    out = pl.pallas_call(
        kernel,
        out_shape=jax.ShapeDtypeStruct((B_pad, OUT), jnp.float32),
        grid_spec=pl.GridSpec(
            grid=(n_tiles,),
            in_specs=in_specs,
            out_specs=pl.BlockSpec((TB, OUT), lambda i: (i, 0)),
        ),
        compiler_params=pltpu.CompilerParams(
            dimension_semantics=("parallel",),
        ),
    )(x, *flat_params)
    return out[:B]


def _reference_forward(x, params):
    """Pure-JAX reference with PyTorch-shaped params (W: [out, in], b: [out])."""
    h = x
    for i, (w, b) in enumerate(params):
        h = h @ w.T + b
        if i != len(params) - 1:
            h = jnp.tanh(h)
    return h


if __name__ == "__main__":
    # Small shapes consistent with Psi(hidden_channels=[32, 64, 64, 16], nn.Tanh())
    hidden_channels = [32, 64, 64, 16]
    batch = 8

    key = jax.random.PRNGKey(0)
    key, kx = jax.random.split(key)
    x = jax.random.normal(kx, (batch, hidden_channels[0]), dtype=jnp.float32)

    params = init_psi_params(key, hidden_channels)
    prepped = prep_psi_params(params)  # one-time layout prep, outside hot path

    # --- small-batch (grid-less, fully fused) path ---
    out = psi_forward(x, prepped)
    out = jax.block_until_ready(out)
    assert out.shape == (batch, hidden_channels[-1]), out.shape
    assert out.dtype == jnp.float32
    ref = _reference_forward(x, params)
    assert jnp.allclose(out, ref, atol=1e-5, rtol=1e-5)

    # --- tiled-batch path (exercises grid + padding; still tiny shapes) ---
    key, kx2 = jax.random.split(key)
    x_big = jax.random.normal(kx2, (1040, hidden_channels[0]), dtype=jnp.float32)
    out_big = psi_forward(x_big, prepped, batch_tile=256)
    out_big = jax.block_until_ready(out_big)
    assert out_big.shape == (1040, hidden_channels[-1]), out_big.shape
    ref_big = _reference_forward(x_big, params)
    assert jnp.allclose(out_big, ref_big, atol=1e-5, rtol=1e-5)

    print("KERNEL_OK")
</pallas_src>

<mosaic_0001>
module attributes {stable_mosaic.version = 11 : i64} {
  func.func @_psi_fused_kernel(%arg0: memref<8x32xf32, #tpu.memory_space<vmem>>, %arg1: memref<32x64xf32, #tpu.memory_space<vmem>>, %arg2: memref<1x64xf32, #tpu.memory_space<vmem>>, %arg3: memref<64x64xf32, #tpu.memory_space<vmem>>, %arg4: memref<1x64xf32, #tpu.memory_space<vmem>>, %arg5: memref<64x16xf32, #tpu.memory_space<vmem>>, %arg6: memref<1x16xf32, #tpu.memory_space<vmem>>, %arg7: memref<8x16xf32, #tpu.memory_space<vmem>>) attributes {dimension_semantics = [], scalar_prefetch = 0 : i64, scratch_operands = 0 : i64, tpu.core_type = #tpu.core_type<tc>} {
    %c0 = arith.constant 0 : index
    %c0_0 = arith.constant 0 : index
    %0 = vector.load %arg0[%c0, %c0_0] : memref<8x32xf32, #tpu.memory_space<vmem>>, vector<8x32xf32>
    %c0_1 = arith.constant 0 : index
    %c0_2 = arith.constant 0 : index
    %1 = vector.load %arg1[%c0_1, %c0_2] : memref<32x64xf32, #tpu.memory_space<vmem>>, vector<32x64xf32>
    %c0_3 = arith.constant 0 : index
    %c0_4 = arith.constant 0 : index
    %2 = vector.load %arg2[%c0_3, %c0_4] : memref<1x64xf32, #tpu.memory_space<vmem>>, vector<1x64xf32>
    %cst = arith.constant dense<0.000000e+00> : vector<8x64xf32>
    %3 = tpu.matmul %0, %1, %cst {dimension_numbers = #tpu.dot_dimension_numbers<[1], [0], [0], [1], [0, 0, 1, 1], [], []>} : vector<8x32xf32>, vector<32x64xf32>, vector<8x64xf32> -> vector<8x64xf32>
    %4 = vector.broadcast %2 : vector<1x64xf32> to vector<8x64xf32>
    %5 = arith.addf %3, %4 : vector<8x64xf32>
    %6 = math.tanh %5 : vector<8x64xf32>
    %c0_5 = arith.constant 0 : index
    %c0_6 = arith.constant 0 : index
    %7 = vector.load %arg3[%c0_5, %c0_6] : memref<64x64xf32, #tpu.memory_space<vmem>>, vector<64x64xf32>
    %c0_7 = arith.constant 0 : index
    %c0_8 = arith.constant 0 : index
    %8 = vector.load %arg4[%c0_7, %c0_8] : memref<1x64xf32, #tpu.memory_space<vmem>>, vector<1x64xf32>
    %cst_9 = arith.constant dense<0.000000e+00> : vector<8x64xf32>
    %9 = tpu.matmul %6, %7, %cst_9 {dimension_numbers = #tpu.dot_dimension_numbers<[1], [0], [0], [1], [0, 0, 1, 1], [], []>} : vector<8x64xf32>, vector<64x64xf32>, vector<8x64xf32> -> vector<8x64xf32>
    %10 = vector.broadcast %8 : vector<1x64xf32> to vector<8x64xf32>
    %11 = arith.addf %9, %10 : vector<8x64xf32>
    %12 = math.tanh %11 : vector<8x64xf32>
    %c0_10 = arith.constant 0 : index
    %c0_11 = arith.constant 0 : index
    %13 = vector.load %arg5[%c0_10, %c0_11] : memref<64x16xf32, #tpu.memory_space<vmem>>, vector<64x16xf32>
    %c0_12 = arith.constant 0 : index
    %c0_13 = arith.constant 0 : index
    %14 = vector.load %arg6[%c0_12, %c0_13] : memref<1x16xf32, #tpu.memory_space<vmem>>, vector<1x16xf32>
    %cst_14 = arith.constant dense<0.000000e+00> : vector<8x16xf32>
    %15 = tpu.matmul %12, %13, %cst_14 {dimension_numbers = #tpu.dot_dimension_numbers<[1], [0], [0], [1], [0, 0, 1, 1], [], []>} : vector<8x64xf32>, vector<64x16xf32>, vector<8x16xf32> -> vector<8x16xf32>
    %16 = vector.broadcast %14 : vector<1x16xf32> to vector<8x16xf32>
    %17 = arith.addf %15, %16 : vector<8x16xf32>
    %c0_15 = arith.constant 0 : index
    %c0_16 = arith.constant 0 : index
    %18 = vector.load %arg7[%c0_15, %c0_16] : memref<8x16xf32, #tpu.memory_space<vmem>>, vector<8x16xf32>
    tpu.vector_store %arg7[%c0_15, %c0_16], %17 {strides = array<i32>} : memref<8x16xf32, #tpu.memory_space<vmem>>, vector<8x16xf32>,
    return
  }
}

</mosaic_0001>

<bundles_post_ra>
// kernel: tpu_custom_call.1
= control target key start
LH: loop header
LB: loop body
LE: loop exit
PB: predicated region body
PF: predicated region fallthrough
CT: control target
= control target key end

     0   :  { %12 = vsyncpa [#allocation3], 0  ;;  %s346_s0 = inlined_call_operand.vmem [shape: f32[8,32], index: 0, kind: input, shape index: {}]   ;;  %s347_s1 = inlined_call_operand.hbm [shape: f32[32,64], index: 1, kind: input, shape index: {}]   ;;  %s348_s2 = inlined_call_operand.vmem [shape: f32[1,64], index: 2, kind: input, shape index: {}]   ;;  %s349_s3 = inlined_call_operand.vmem [shape: f32[64,64], index: 3, kind: input, shape index: {}]   ;;  %s350_s4 = inlined_call_operand.vmem [shape: f32[1,64], index: 4, kind: input, shape index: {}]   ;;  %s351_s5 = inlined_call_operand.vmem [shape: f32[64,16], index: 5, kind: input, shape index: {}]   ;;  %s352_s6 = inlined_call_operand.vmem [shape: f32[1,16], index: 6, kind: input, shape index: {}]   ;;  %s353_s7 = inlined_call_operand.hbm [shape: f32[8,16], index: 7, kind: output, shape index: {}]  }
   0x1   :  { %13 = vsyncpa [#allocation4], 0  ;;  %s20_s26 = sshll.u32 %s347_s1, 4  ;;  %s234_s27 = smov [#allocation2]   ;;  %s21_s26 = int_to_ptr.hbm [resolvable:$true] %s20_s26 }
   0x2   :  { %s22_s28 = sshll.u32 %s234_s27, 4  ;;  %s235_s29 = smov 128   ;;  %s23_s28 = int_to_ptr.vmem [resolvable:$true] %s22_s28 }
   0x3   :  { %s236_s30 = smov 8  }
   0x4   :  { %28 = dma.hbm_to_vmem [thread:$0]  %s21_s26, 512, %s23_s28, [#allocation3], %s235_s29, %s235_s29, %s236_s30  }
   0x5   :  { %230 = dma.done.wait [#allocation3], 512  }
   0x6   :  { %231 = vsyncadd [#allocation3], 4294966784  ;;  %v47_v0 = vld [vmem:[#allocation2 + $0x18] sm:$0xff]  ;;  %v46_v1 = vld [vmem:[#allocation2 + $0x10] sm:$0xff]  ;;  %vm52_vm0 = vcmask 261120   ;;  %vm89_vm1 = vcmask 523264  }
   0x7   :  { %68 = vmatpush.msra.mxu0 %v47_v0  ;;  %v84_v2 = vld [vmem:[%s349_s3 + $0x38] sm:$0xff]  ;;  %v45_v3 = vld [vmem:[#allocation2 + $0x8] sm:$0xff]  ;;  %v83_v4 = vld [vmem:[%s349_s3 + $0x30] sm:$0xff]  ;;  %s237_s20 = smov [#allocation5]   ;;  %s158_s22 = sshll.u32 %s353_s7, 4  ;;  %vm149_vm2 = vcmask 130048   ;;  %s159_s22 = int_to_ptr.hbm [resolvable:$true] %s158_s22 }
   0x8   :  { %101 = vmatpush.msra.mxu1 %v84_v2  ;;  %v82_v5 = vld [vmem:[%s349_s3 + $0x28] sm:$0xff]  ;;  %v44_v6 = vld [vmem:[#allocation2] sm:$0xff]  ;;  %v80_v9 = vld [vmem:[%s349_s3 + $0x18] sm:$0xff]  ;;  %s156_s21 = sshll.u32 %s237_s20, 4  ;;  %s157_s21 = int_to_ptr.vmem [resolvable:$true] %s156_s21 }
   0x9   :  { %69 = vmatpush.msra.mxu0 %v46_v1  ;;  %v43_v7 = vld [vmem:[%s346_s0] sm:$0xff]  ;;  %v79_v10 = vld [vmem:[%s349_s3 + $0x10] sm:$0xff]  ;;  %v78_v11 = vld [vmem:[%s349_s3 + $0x8] sm:$0xff] }
   0xa   :  { %102 = vmatpush.msra.mxu1 %v83_v4  ;;  %v81_v8 = vld [vmem:[%s349_s3 + $0x20] sm:$0xff]  ;;  %v121_v13 = vld [vmem:[%s351_s5 + $0x38] sm:$0xff]  ;;  %v120_v14 = vld [vmem:[%s351_s5 + $0x30] sm:$0xff] }
   0xb   :  { %70 = vmatpush.msra.mxu0 %v45_v3  ;;  %v77_v12 = vld [vmem:[%s349_s3] sm:$0xff]  ;;  %137 = vmatpush.msra.mxu2 %v121_v13  ;;  %v119_v15 = vld [vmem:[%s351_s5 + $0x28] sm:$0xff]  ;;  %v117_v21 = vld [vmem:[%s351_s5 + $0x18] sm:$0xff] }
   0xc   :  { %103 = vmatpush.msra.mxu1 %v82_v5  ;;  %v175_v16 = vld [vmem:[%s348_s2] ss:$0 sm:$0xff]  ;;  %v116_v22 = vld [vmem:[%s351_s5 + $0x10] sm:$0xff]  ;;  %v115_v23 = vld [vmem:[%s351_s5 + $0x8] sm:$0xff] }
   0xd   :  { %71 = vmatpush.msra.mxu0 %v44_v6  ;;  %138 = vmatpush.msra.mxu2 %v120_v14  ;;  %v118_v20 = vld [vmem:[%s351_s5 + $0x20] sm:$0xff] }
   0xe   :  { %168 = vmatmul.msk.f32.vlgmr.msra.gmra.mxu0 %vm52_vm0, %v43_v7  ;;  %104 = vmatpush.msra.mxu1 %v81_v8  ;;  %v114_v24 = vld [vmem:[%s351_s5] sm:$0xff] }
   0xf   :  { %139 = vmatpush.msra.mxu2 %v119_v15  ;;  %v176_v25 = vld [vmem:[%s350_s4] ss:$0 sm:$0xff] }
  0x10   :  { %105 = vmatpush.msra.mxu1 %v80_v9  ;;  %v177_v29 = vld [vmem:[%s352_s6] ss:$0 sm:$0xff] }
  0x11   :  { %140 = vmatpush.msra.mxu2 %v118_v20 }
  0x12   :  { %106 = vmatpush.msra.mxu1 %v79_v10 }
  0x13   :  { %141 = vmatpush.msra.mxu2 %v117_v21 }
  0x14   :  { %107 = vmatpush.msra.mxu1 %v78_v11 }
  0x15   :  { %142 = vmatpush.msra.mxu2 %v116_v22 }
  0x16   :  { %108 = vmatpush.msra.mxu1 %v77_v12 }
  0x17   :  { %143 = vmatpush.msra.mxu2 %v115_v23 }
  0x19   :  { %144 = vmatpush.msra.mxu2 %v114_v24 }
  0x8b   :  { %v73_v17 = vpop.f32.mrf.mxu0 }
  0x8c   :  { %v74_v18 = vadd.f32 %v175_v16, %v73_v17 }
  0x8e   :  { %178 = vtanh.f32 %v74_v18 }
  0x94   :  { %v179_v19 = vpop.eup %178 }
  0x95   :  { %169 = vmatmul.msk.f32.vlgmr.msra.gmra.mxu1 %vm89_vm1, %v179_v19 }
 0x112   :  { %v110_v26 = vpop.f32.mrf.mxu1 }
 0x113   :  { %v111_v27 = vadd.f32 %v176_v25, %v110_v26 }
 0x115   :  { %180 = vtanh.f32 %v111_v27 }
 0x11b   :  { %v181_v28 = vpop.eup %180 }
 0x11c   :  { %170 = vmatmul.msk.f32.vlgmr.msra.gmra.mxu2 %vm89_vm1, %v181_v28 }
 0x19f   :  { %v146_v30 = vpop.f32.mrf.mxu2 }
 0x1a0   :  { %v147_v31 = vadd.f32 %v177_v29, %v146_v30 }
 0x1a2   :  { %150 = vst.msk [vmem:[#allocation5] sm:$0xff] %vm149_vm2, %v147_v31 }
 0x1a3   :  { %161 = dma.vmem_to_hbm [thread:$0]  %s157_s21, 128, %s159_s22, [#allocation4]  }
 0x1a4   :  { %232 = dma.done.wait [#allocation4], 128  }
 0x1a5   :  { %233 = vsyncadd [#allocation4], 4294967168 }
 0x1a6   :  { %166 = vsyncpa [#allocation3], 1 }
 0x1a7   :  { %167 = vsyncpa [#allocation4], 1 }

</bundles_post_ra>
